<compile_context>
chip_gen: v5e
topology: v5e:2x2
jax: 0.10.0
libtpu: 0.0.40
codegen_flags: <defaults>
</compile_context>

<pallas_src>
import jax
import jax.numpy as jnp
from jax.experimental import pallas as pl
from jax.experimental.pallas import tpu as pltpu


def _round_up(x, m):
    return (x + m - 1) // m * m


def make_combined_loss_kernel(alpha, gamma, defects_class, w_cls, w_anom, w_sim,
                              hw, hw_padded):
    alpha = float(alpha)
    gamma = float(gamma)
    defects_class = int(defects_class)
    w_cls = float(w_cls)
    w_anom = float(w_anom)
    w_sim = float(w_sim)
    hw = int(hw)
    hw_padded = int(hw_padded)

    def kernel(logits_ref, labels_ref, amap_ref, emb_ref, refemb_ref,
               out_ref, acc_ref):
        i = pl.program_id(0)
        n = pl.num_programs(0)

        @pl.when(i == 0)
        def _init():
            acc_ref[0] = jnp.float32(0.0)

        # ---- anomaly BCE-with-logits: partial sum over this lane tile ----
        x = amap_ref[...].astype(jnp.float32)              # (B, L) widen post-DMA
        labels = labels_ref[...]                           # (B, 1) int32
        B, L = x.shape
        t = (labels == defects_class).astype(jnp.float32)  # (B, 1), broadcasts
        bce = jnp.maximum(x, 0.0) - x * t + jnp.log1p(jnp.exp(-jnp.abs(x)))
        if hw_padded != hw:                                 # mask zero-padded lanes
            lane = jax.lax.broadcasted_iota(jnp.int32, (B, L), 1)
            valid = (i * L + lane) < hw
            bce = jnp.where(valid, bce, 0.0)
        acc_ref[0] += jnp.sum(bce)

        # ---- epilogue (tiny): focal CE + cosine loss + totals ------------
        @pl.when(i == n - 1)
        def _finalize():
            loss_anom = acc_ref[0] / jnp.float32(B * hw)

            logits = logits_ref[...].astype(jnp.float32)    # (B, C)
            C = logits.shape[1]
            iota_c = jax.lax.broadcasted_iota(jnp.int32, (B, C), 1)
            one_hot = (iota_c == labels).astype(jnp.float32)
            m = jnp.max(logits, axis=-1, keepdims=True)
            lse = jnp.log(jnp.sum(jnp.exp(logits - m), axis=-1, keepdims=True)) + m
            ce = lse - jnp.sum(one_hot * logits, axis=-1, keepdims=True)  # (B, 1)
            pt = jnp.exp(-ce)
            base = jnp.maximum(1.0 - pt, 0.0)               # clamp: no NaN in pow
            if gamma == 2.0:
                mod = jnp.square(base)                      # VPU mul, no EUP pow
            else:
                mod = base ** gamma
            loss_cls = jnp.sum(alpha * mod * ce) / jnp.float32(B)

            e = emb_ref[...].astype(jnp.float32)            # (B, D)
            r = refemb_ref[...].astype(jnp.float32)         # (B, D)
            dot = jnp.sum(e * r, axis=-1, keepdims=True)
            ne = jnp.sqrt(jnp.sum(e * e, axis=-1, keepdims=True))
            nr = jnp.sqrt(jnp.sum(r * r, axis=-1, keepdims=True))
            cos = dot / jnp.maximum(ne * nr, 1e-8)
            loss_sim = jnp.sum(1.0 - cos) / jnp.float32(B)

            total = w_cls * loss_cls + w_anom * loss_anom + w_sim * loss_sim
            out_ref[0] = total
            out_ref[1] = loss_cls
            out_ref[2] = loss_anom
            out_ref[3] = loss_sim

    return kernel


def combined_loss(region_logits, labels, anomaly_map, embedding, ref_embedding,
                  *, alpha=0.25, gamma=2.0, defects_class=1,
                  w_cls=1.0, w_anom=0.5, w_sim=0.1, lane_tile=None):
    B, C = region_logits.shape
    D = embedding.shape[-1]

    # Keep the anomaly map in its native dtype: the DMA moves narrow data and
    # the kernel widens to f32 on the VPU (this path is HBM-bandwidth bound).
    amap2d = anomaly_map.reshape(B, -1)
    hw = amap2d.shape[1]
    itemsize = jnp.dtype(amap2d.dtype).itemsize

    if lane_tile is None:
        target_block_bytes = 4 << 20      # ~4 MiB lane-dense blocks; v7x-safe
        lanes = max(512, target_block_bytes // max(B * itemsize, 1))
        lanes = min(lanes, _round_up(hw, 128))
        lane_tile = _round_up(lanes, 128)
    hw_padded = _round_up(hw, lane_tile)
    if hw_padded != hw:
        amap2d = jnp.pad(amap2d, ((0, 0), (0, hw_padded - hw)))
    grid = (hw_padded // lane_tile,)

    labels2d = labels.astype(jnp.int32).reshape(B, 1)

    kernel = make_combined_loss_kernel(alpha, gamma, defects_class,
                                       w_cls, w_anom, w_sim, hw, hw_padded)

    block_bytes = B * lane_tile * itemsize
    small_bytes = (B * C + B + 2 * B * D) * 4
    vmem_limit = int(min(64 << 20,
                         max(32 << 20, 6 * block_bytes + 4 * small_bytes)))

    out = pl.pallas_call(
        kernel,
        out_shape=jax.ShapeDtypeStruct((4,), jnp.float32),
        grid=grid,
        in_specs=[
            pl.BlockSpec((B, C), lambda i: (0, 0)),          # logits (resident)
            pl.BlockSpec((B, 1), lambda i: (0, 0)),          # labels (resident)
            pl.BlockSpec((B, lane_tile), lambda i: (0, i)),  # anomaly map tiles
            pl.BlockSpec((B, D), lambda i: (0, 0)),          # embedding
            pl.BlockSpec((B, D), lambda i: (0, 0)),          # ref embedding
        ],
        out_specs=pl.BlockSpec(memory_space=pltpu.MemorySpace.SMEM),
        scratch_shapes=[pltpu.SMEM((1,), jnp.float32)],      # BCE partial sum
        compiler_params=pltpu.CompilerParams(
            dimension_semantics=("arbitrary",),              # reduction axis
            vmem_limit_bytes=vmem_limit),
    )(region_logits, labels2d, amap2d, embedding, ref_embedding)

    return {"total": out[0], "classification": out[1],
            "anomaly": out[2], "similarity": out[3]}


def _reference(region_logits, labels, anomaly_map, embedding, ref_embedding,
               alpha, gamma, defects_class, w_cls, w_anom, w_sim):
    # Pure-JAX reference replicating PyTorch semantics.
    logits = region_logits.astype(jnp.float32)
    lse = jax.nn.logsumexp(logits, axis=-1)
    ce = lse - jnp.take_along_axis(logits, labels[:, None], axis=-1)[:, 0]
    pt = jnp.exp(-ce)
    loss_cls = jnp.mean(alpha * (1.0 - pt) ** gamma * ce)

    x = anomaly_map.astype(jnp.float32)
    t = (labels == defects_class).astype(jnp.float32).reshape(-1, 1, 1, 1)
    t = jnp.broadcast_to(t, x.shape)
    bce = jnp.maximum(x, 0.0) - x * t + jnp.log1p(jnp.exp(-jnp.abs(x)))
    loss_anom = jnp.mean(bce)

    e = embedding.astype(jnp.float32)
    r = ref_embedding.astype(jnp.float32)
    cos = jnp.sum(e * r, -1) / jnp.maximum(
        jnp.linalg.norm(e, axis=-1) * jnp.linalg.norm(r, axis=-1), 1e-8)
    loss_sim = jnp.mean(1.0 - cos)

    total = w_cls * loss_cls + w_anom * loss_anom + w_sim * loss_sim
    return total, loss_cls, loss_anom, loss_sim


def _check(region_logits, labels, anomaly_map, embedding, ref_embedding,
           alpha, gamma, defects_class, w_cls, w_anom, w_sim, **kw):
    losses = combined_loss(region_logits, labels, anomaly_map, embedding,
                           ref_embedding, alpha=alpha, gamma=gamma,
                           defects_class=defects_class,
                           w_cls=w_cls, w_anom=w_anom, w_sim=w_sim, **kw)
    jax.block_until_ready(losses["total"])
    ref_total, ref_cls, ref_anom, ref_sim = _reference(
        region_logits, labels, anomaly_map, embedding, ref_embedding,
        alpha, gamma, defects_class, w_cls, w_anom, w_sim)
    assert jnp.allclose(losses["classification"], ref_cls, atol=1e-5, rtol=1e-5)
    assert jnp.allclose(losses["anomaly"], ref_anom, atol=1e-5, rtol=1e-5)
    assert jnp.allclose(losses["similarity"], ref_sim, atol=1e-5, rtol=1e-5)
    assert jnp.allclose(losses["total"], ref_total, atol=1e-5, rtol=1e-5)


if __name__ == "__main__":
    alpha, gamma = 0.25, 2.0
    defects_class = 1                     # config.data.class_map.defects
    w_cls, w_anom, w_sim = 1.0, 0.5, 0.1  # config.loss.weights

    key = jax.random.PRNGKey(0)
    k1, k2, k3, k4, k5 = jax.random.split(key, 5)

    # Case 1: small shapes consistent with the module's forward (single tile).
    B, C, H, W, D = 2, 4, 16, 16, 32
    region_logits = jax.random.normal(k1, (B, C), dtype=jnp.float32)
    labels = jax.random.randint(k2, (B,), 0, C, dtype=jnp.int32)
    anomaly_map = jax.random.normal(k3, (B, 1, H, W), dtype=jnp.float32)
    embedding = jax.random.normal(k4, (B, D), dtype=jnp.float32)
    ref_embedding = jax.random.normal(k5, (B, D), dtype=jnp.float32)
    _check(region_logits, labels, anomaly_map, embedding, ref_embedding,
           alpha, gamma, defects_class, w_cls, w_anom, w_sim)

    # Case 2: exercise the gridded/padded reduction path (multi-step grid).
    H2 = W2 = 48                                    # 2304 elems -> padded to 2560
    anomaly_map2 = jax.random.normal(k3, (B, 1, H2, W2), dtype=jnp.float32)
    _check(region_logits, labels, anomaly_map2, embedding, ref_embedding,
           alpha, gamma, defects_class, w_cls, w_anom, w_sim, lane_tile=512)

    print("KERNEL_OK")
</pallas_src>

<mosaic_0001>
module attributes {stable_mosaic.version = 11 : i64} {
  func.func @kernel(%arg0: i32, %arg1: memref<2x4xf32, #tpu.memory_space<vmem>>, %arg2: memref<2x1xi32, #tpu.memory_space<vmem>>, %arg3: memref<2x256xf32, #tpu.memory_space<vmem>>, %arg4: memref<2x32xf32, #tpu.memory_space<vmem>>, %arg5: memref<2x32xf32, #tpu.memory_space<vmem>>, %arg6: memref<4xf32, #tpu.memory_space<smem>>, %arg7: memref<1xf32, #tpu.memory_space<smem>>) attributes {dimension_semantics = [#tpu.dimension_semantics<arbitrary>], iteration_bounds = array<i64: 1>, scalar_prefetch = 0 : i64, scratch_operands = 1 : i64, tpu.core_type = #tpu.core_type<tc>, window_params = [{pipeline_mode = #tpu.pipeline_mode<synchronous>, transform_indices = @transform_0, window_bounds = array<i64: 2, 4>}, {pipeline_mode = #tpu.pipeline_mode<synchronous>, transform_indices = @transform_1, window_bounds = array<i64: 2, 1>}, {transform_indices = @transform_2, window_bounds = array<i64: 2, 256>}, {pipeline_mode = #tpu.pipeline_mode<synchronous>, transform_indices = @transform_3, window_bounds = array<i64: 2, 32>}, {pipeline_mode = #tpu.pipeline_mode<synchronous>, transform_indices = @transform_4, window_bounds = array<i64: 2, 32>}, {transform_indices = @transform_5, window_bounds = array<i64: 4>}]} {
    %c0_i32 = arith.constant 0 : i32
    %0 = arith.cmpi eq, %arg0, %c0_i32 : i32
    %1 = arith.extui %0 : i1 to i32
    %c0_i32_0 = arith.constant 0 : i32
    %2 = arith.cmpi ne, %1, %c0_i32_0 : i32
    scf.if %2 {
      %cst_10 = arith.constant 0.000000e+00 : f32
      %c0_11 = arith.constant 0 : index
      %30 = memref.load %arg7[%c0_11] : memref<1xf32, #tpu.memory_space<smem>>
      memref.store %cst_10, %arg7[%c0_11] : memref<1xf32, #tpu.memory_space<smem>>
    } else {
    }
    %c0 = arith.constant 0 : index
    %c0_1 = arith.constant 0 : index
    %3 = vector.load %arg3[%c0, %c0_1] : memref<2x256xf32, #tpu.memory_space<vmem>>, vector<2x256xf32>
    %c0_2 = arith.constant 0 : index
    %c0_3 = arith.constant 0 : index
    %4 = vector.load %arg2[%c0_2, %c0_3] : memref<2x1xi32, #tpu.memory_space<vmem>>, vector<2x1xi32>
    %c1_i32 = arith.constant 1 : i32
    %5 = vector.broadcast %c1_i32 : i32 to vector<2x1xi32>
    %6 = arith.cmpi eq, %4, %5 : vector<2x1xi32>
    %7 = arith.extui %6 : vector<2x1xi1> to vector<2x1xi32>
    %8 = arith.sitofp %7 : vector<2x1xi32> to vector<2x1xf32>
    %cst = arith.constant 0.000000e+00 : f32
    %9 = vector.broadcast %cst : f32 to vector<2x256xf32>
    %10 = arith.maximumf %3, %9 : vector<2x256xf32>
    %11 = vector.broadcast %8 : vector<2x1xf32> to vector<2x256xf32>
    %12 = arith.mulf %3, %11 : vector<2x256xf32>
    %13 = arith.subf %10, %12 : vector<2x256xf32>
    %14 = math.absf %3 : vector<2x256xf32>
    %cst_4 = arith.constant 0.000000e+00 : f32
    %15 = vector.broadcast %cst_4 : f32 to vector<2x256xf32>
    %16 = arith.subf %15, %14 : vector<2x256xf32>
    %17 = math.exp %16 : vector<2x256xf32>
    %18 = math.log1p %17 : vector<2x256xf32>
    %19 = arith.addf %13, %18 : vector<2x256xf32>
    %c0_5 = arith.constant 0 : index
    %20 = memref.load %arg7[%c0_5] : memref<1xf32, #tpu.memory_space<smem>>
    %21 = vector.shape_cast %19 : vector<2x256xf32> to vector<1x2x256xf32>
    %cst_6 = arith.constant dense<0.000000e+00> : vector<1xf32>
    %22 = vector.multi_reduction <add>, %21, %cst_6 [1, 2] : vector<1x2x256xf32> to vector<1xf32>
    %23 = vector.shape_cast %22 : vector<1xf32> to vector<1x1x1xf32>
    %24 = vector.extract %23[0, 0, 0] : f32 from vector<1x1x1xf32>
    %25 = arith.addf %20, %24 : f32
    %c0_7 = arith.constant 0 : index
    %26 = memref.load %arg7[%c0_7] : memref<1xf32, #tpu.memory_space<smem>>
    memref.store %25, %arg7[%c0_7] : memref<1xf32, #tpu.memory_space<smem>>
    %c0_i32_8 = arith.constant 0 : i32
    %27 = arith.cmpi eq, %arg0, %c0_i32_8 : i32
    %28 = arith.extui %27 : i1 to i32
    %c0_i32_9 = arith.constant 0 : i32
    %29 = arith.cmpi ne, %28, %c0_i32_9 : i32
    scf.if %29 {
      %c0_10 = arith.constant 0 : index
      %30 = memref.load %arg7[%c0_10] : memref<1xf32, #tpu.memory_space<smem>>
      %cst_11 = arith.constant 5.120000e+02 : f32
      %31 = arith.divf %30, %cst_11 : f32
      %c0_12 = arith.constant 0 : index
      %c0_13 = arith.constant 0 : index
      %32 = vector.load %arg1[%c0_12, %c0_13] : memref<2x4xf32, #tpu.memory_space<vmem>>, vector<2x4xf32>
      %33 = tpu.iota {dimensions = array<i32: 1>} : vector<2x4xi32>
      %34 = vector.broadcast %4 : vector<2x1xi32> to vector<2x4xi32>
      %35 = arith.cmpi eq, %33, %34 : vector<2x4xi32>
      %36 = arith.extui %35 : vector<2x4xi1> to vector<2x4xi32>
      %37 = arith.sitofp %36 : vector<2x4xi32> to vector<2x4xf32>
      %cst_14 = arith.constant dense<0xFF800000> : vector<2xf32>
      %38 = vector.multi_reduction <maximumf>, %32, %cst_14 [1] : vector<2x4xf32> to vector<2xf32>
      %39 = vector.shape_cast %38 : vector<2xf32> to vector<2x1xf32>
      %40 = vector.broadcast %39 : vector<2x1xf32> to vector<2x4xf32>
      %41 = arith.subf %32, %40 : vector<2x4xf32>
      %42 = math.exp %41 : vector<2x4xf32>
      %cst_15 = arith.constant dense<0.000000e+00> : vector<2xf32>
      %43 = vector.multi_reduction <add>, %42, %cst_15 [1] : vector<2x4xf32> to vector<2xf32>
      %44 = vector.shape_cast %43 : vector<2xf32> to vector<2x1xf32>
      %45 = math.log %44 : vector<2x1xf32>
      %46 = arith.addf %45, %39 : vector<2x1xf32>
      %47 = arith.mulf %37, %32 : vector<2x4xf32>
      %cst_16 = arith.constant dense<0.000000e+00> : vector<2xf32>
      %48 = vector.multi_reduction <add>, %47, %cst_16 [1] : vector<2x4xf32> to vector<2xf32>
      %49 = vector.shape_cast %48 : vector<2xf32> to vector<2x1xf32>
      %50 = arith.subf %46, %49 : vector<2x1xf32>
      %cst_17 = arith.constant 0.000000e+00 : f32
      %51 = vector.broadcast %cst_17 : f32 to vector<2x1xf32>
      %52 = arith.subf %51, %50 : vector<2x1xf32>
      %53 = math.exp %52 : vector<2x1xf32>
      %cst_18 = arith.constant 1.000000e+00 : f32
      %54 = vector.broadcast %cst_18 : f32 to vector<2x1xf32>
      %55 = arith.subf %54, %53 : vector<2x1xf32>
      %cst_19 = arith.constant 0.000000e+00 : f32
      %56 = vector.broadcast %cst_19 : f32 to vector<2x1xf32>
      %57 = arith.maximumf %55, %56 : vector<2x1xf32>
      %58 = arith.mulf %57, %57 : vector<2x1xf32>
      %cst_20 = arith.constant 2.500000e-01 : f32
      %59 = vector.broadcast %cst_20 : f32 to vector<2x1xf32>
      %60 = arith.mulf %59, %58 : vector<2x1xf32>
      %61 = arith.mulf %60, %50 : vector<2x1xf32>
      %62 = vector.shape_cast %61 : vector<2x1xf32> to vector<1x2x1xf32>
      %cst_21 = arith.constant dense<0.000000e+00> : vector<1xf32>
      %63 = vector.multi_reduction <add>, %62, %cst_21 [1, 2] : vector<1x2x1xf32> to vector<1xf32>
      %64 = vector.shape_cast %63 : vector<1xf32> to vector<1x1x1xf32>
      %65 = vector.extract %64[0, 0, 0] : f32 from vector<1x1x1xf32>
      %cst_22 = arith.constant 2.000000e+00 : f32
      %66 = arith.divf %65, %cst_22 : f32
      %c0_23 = arith.constant 0 : index
      %c0_24 = arith.constant 0 : index
      %67 = vector.load %arg4[%c0_23, %c0_24] : memref<2x32xf32, #tpu.memory_space<vmem>>, vector<2x32xf32>
      %c0_25 = arith.constant 0 : index
      %c0_26 = arith.constant 0 : index
      %68 = vector.load %arg5[%c0_25, %c0_26] : memref<2x32xf32, #tpu.memory_space<vmem>>, vector<2x32xf32>
      %69 = arith.mulf %67, %68 : vector<2x32xf32>
      %cst_27 = arith.constant dense<0.000000e+00> : vector<2xf32>
      %70 = vector.multi_reduction <add>, %69, %cst_27 [1] : vector<2x32xf32> to vector<2xf32>
      %71 = vector.shape_cast %70 : vector<2xf32> to vector<2x1xf32>
      %72 = arith.mulf %67, %67 : vector<2x32xf32>
      %cst_28 = arith.constant dense<0.000000e+00> : vector<2xf32>
      %73 = vector.multi_reduction <add>, %72, %cst_28 [1] : vector<2x32xf32> to vector<2xf32>
      %74 = vector.shape_cast %73 : vector<2xf32> to vector<2x1xf32>
      %75 = math.sqrt %74 : vector<2x1xf32>
      %76 = arith.mulf %68, %68 : vector<2x32xf32>
      %cst_29 = arith.constant dense<0.000000e+00> : vector<2xf32>
      %77 = vector.multi_reduction <add>, %76, %cst_29 [1] : vector<2x32xf32> to vector<2xf32>
      %78 = vector.shape_cast %77 : vector<2xf32> to vector<2x1xf32>
      %79 = math.sqrt %78 : vector<2x1xf32>
      %80 = arith.mulf %75, %79 : vector<2x1xf32>
      %cst_30 = arith.constant 9.99999993E-9 : f32
      %81 = vector.broadcast %cst_30 : f32 to vector<2x1xf32>
      %82 = arith.maximumf %80, %81 : vector<2x1xf32>
      %83 = arith.divf %71, %82 : vector<2x1xf32>
      %cst_31 = arith.constant 1.000000e+00 : f32
      %84 = vector.broadcast %cst_31 : f32 to vector<2x1xf32>
      %85 = arith.subf %84, %83 : vector<2x1xf32>
      %86 = vector.shape_cast %85 : vector<2x1xf32> to vector<1x2x1xf32>
      %cst_32 = arith.constant dense<0.000000e+00> : vector<1xf32>
      %87 = vector.multi_reduction <add>, %86, %cst_32 [1, 2] : vector<1x2x1xf32> to vector<1xf32>
      %88 = vector.shape_cast %87 : vector<1xf32> to vector<1x1x1xf32>
      %89 = vector.extract %88[0, 0, 0] : f32 from vector<1x1x1xf32>
      %cst_33 = arith.constant 2.000000e+00 : f32
      %90 = arith.divf %89, %cst_33 : f32
      %cst_34 = arith.constant 1.000000e+00 : f32
      %91 = arith.mulf %cst_34, %66 : f32
      %cst_35 = arith.constant 5.000000e-01 : f32
      %92 = arith.mulf %cst_35, %31 : f32
      %93 = arith.addf %91, %92 : f32
      %cst_36 = arith.constant 1.000000e-01 : f32
      %94 = arith.mulf %cst_36, %90 : f32
      %95 = arith.addf %93, %94 : f32
      %c0_37 = arith.constant 0 : index
      %96 = memref.load %arg6[%c0_37] : memref<4xf32, #tpu.memory_space<smem>>
      memref.store %95, %arg6[%c0_37] : memref<4xf32, #tpu.memory_space<smem>>
      %c1 = arith.constant 1 : index
      %97 = memref.load %arg6[%c1] : memref<4xf32, #tpu.memory_space<smem>>
      memref.store %66, %arg6[%c1] : memref<4xf32, #tpu.memory_space<smem>>
      %c2 = arith.constant 2 : index
      %98 = memref.load %arg6[%c2] : memref<4xf32, #tpu.memory_space<smem>>
      memref.store %31, %arg6[%c2] : memref<4xf32, #tpu.memory_space<smem>>
      %c3 = arith.constant 3 : index
      %99 = memref.load %arg6[%c3] : memref<4xf32, #tpu.memory_space<smem>>
      memref.store %90, %arg6[%c3] : memref<4xf32, #tpu.memory_space<smem>>
    } else {
    }
    return
  }
  func.func @transform_0(%arg0: i32) -> (i32, i32) {
    %c0_i32 = arith.constant 0 : i32
    %c0_i32_0 = arith.constant 0 : i32
    %c0_i32_1 = arith.constant 0 : i32
    return %c0_i32, %c0_i32_0 : i32, i32
  }
  func.func @transform_1(%arg0: i32) -> (i32, i32) {
    %c0_i32 = arith.constant 0 : i32
    %c0_i32_0 = arith.constant 0 : i32
    %c0_i32_1 = arith.constant 0 : i32
    return %c0_i32, %c0_i32_0 : i32, i32
  }
  func.func @transform_2(%arg0: i32) -> (i32, i32) {
    %c0_i32 = arith.constant 0 : i32
    %c0_i32_0 = arith.constant 0 : i32
    return %c0_i32, %arg0 : i32, i32
  }
  func.func @transform_3(%arg0: i32) -> (i32, i32) {
    %c0_i32 = arith.constant 0 : i32
    %c0_i32_0 = arith.constant 0 : i32
    %c0_i32_1 = arith.constant 0 : i32
    return %c0_i32, %c0_i32_0 : i32, i32
  }
  func.func @transform_4(%arg0: i32) -> (i32, i32) {
    %c0_i32 = arith.constant 0 : i32
    %c0_i32_0 = arith.constant 0 : i32
    %c0_i32_1 = arith.constant 0 : i32
    return %c0_i32, %c0_i32_0 : i32, i32
  }
  func.func @transform_5(%arg0: i32) -> i32 {
    %c0_i32 = arith.constant 0 : i32
    %c0_i32_0 = arith.constant 0 : i32
    return %c0_i32 : i32
  }
}

</mosaic_0001>

<bundles_post_ra>
// kernel: tpu_custom_call.1
= control target key start
LH: loop header
LB: loop body
LE: loop exit
PB: predicated region body
PF: predicated region fallthrough
CT: control target
= control target key end

     0   :  { %10 = vsyncpa [#allocation4], 0  ;;  %s456_s0 = inlined_call_operand.hbm [shape: f32[2,4], index: 0, kind: input, shape index: {}]   ;;  %s457_s1 = inlined_call_operand.vmem [shape: s32[2,1], index: 1, kind: input, shape index: {}]   ;;  %s458_s2 = inlined_call_operand.vmem [shape: f32[2,256], index: 2, kind: input, shape index: {}]   ;;  %s459_s3 = inlined_call_operand.hbm [shape: f32[2,32], index: 3, kind: input, shape index: {}]   ;;  %s460_s4 = inlined_call_operand.vmem [shape: f32[2,32], index: 4, kind: input, shape index: {}]   ;;  %s461_s5 = inlined_call_operand.hbm [shape: f32[4], index: 5, kind: output, shape index: {}]  }
   0x1   :  { %11 = vsyncpa [#allocation7], 0 }
   0x2   :  { %12 = vsyncpa [#allocation5], 0  ;;  %s18_s20 = sshll.u32 %s456_s0, 4  ;;  %s390_s21 = smov [#allocation3]   ;;  %s19_s20 = int_to_ptr.hbm [resolvable:$true] %s18_s20 }
   0x3   :  { %s20_s22 = sshll.u32 %s390_s21, 4  ;;  %s33_s25 = sshll.u32 %s459_s3, 4  ;;  %s21_s22 = int_to_ptr.vmem [resolvable:$true] %s20_s22  ;;  %s34_s25 = int_to_ptr.hbm [resolvable:$true] %s33_s25 }
   0x4   :  { %23 = dma.hbm_to_vmem [thread:$0]  %s19_s20, 32, %s21_s22, [#allocation4]  }
   0x5   :  { %s391_s26 = smov [#allocation6]  }
   0x6   :  { %s35_s27 = sshll.u32 %s391_s26, 4  ;;  %s36_s27 = int_to_ptr.vmem [resolvable:$true] %s35_s27 }
   0x7   :  { %38 = dma.hbm_to_vmem [thread:$0]  %s34_s25, 32, %s36_s27, [#allocation7]  }
   0x8   :  { %384 = dma.done.wait [#allocation4], 32  }
   0x9   :  { %385 = vsyncadd [#allocation4], 4294967264 }
   0xa   :  { %386 = dma.done.wait [#allocation7], 32  }
   0xb   :  { %387 = vsyncadd [#allocation7], 4294967264  ;;  %v392_v0 = vmov 0   ;;  %vm131_vm0 = vcmask 25600   ;;  %v122_v1 = vld [vmem:[#allocation3] sm:$0x3]  ;;  %v123_v17 = vlaneseq }
   0xc   :  { %302 = vset.pattern.permute.xlu0 %v392_v0  ;;  %303 = vset.pattern.permute.xlu1 %v392_v0  ;;  %v177_v2 = vld [vmem:[#allocation6] sm:$0x3]  ;;  %vm180_vm1 = vcmask 254976   ;;  %v132_v3 = vsel %vm131_vm0, %v122_v1, -inf  ;;  %v178_v5 = vld [vmem:[%s460_s4] sm:$0x3] }
   0xd   :  { %v184_v4 = vmul.f32 %v177_v2, %v177_v2  ;;  %133 = vmax.xlane.f32.xlu0 %v132_v3  ;;  %v200_v7 = vmul.f32 %v178_v5, %v178_v5  ;;  %v56_v9 = vld [vmem:[%s457_s1] sm:$0x3]  ;;  %v393_v10 = vmov 0.0   ;;  %v124_v18 = vand.u32 127, %v123_v17  ;;  %s270_s16 = sshll.u32 %s461_s5, 4  ;;  %s397_s19 = smov [#allocation8]   ;;  %s271_s16 = int_to_ptr.hbm [resolvable:$true] %s270_s16 }
   0xe   :  { %vm57_vm2 = vcmp.eq.s32.totalorder %v56_v9, 1  ;;  %v179_v23 = vmul.f32 %v178_v5, %v177_v2  ;;  %v55_v26 = vld [vmem:[%s458_s2] sm:$0xf]  ;;  %v394_v35 = vmov 269488144   ;;  %vm93_vm5 = vcmask 1041408  }
   0xf   :  { %v185_v6 = vsel %vm180_vm1, %v184_v4, 0.0  ;;  %v201_v8 = vsel %vm180_vm1, %v200_v7, 0.0  ;;  %v282_v11 = vsel %vm57_vm2, 1.0, %v393_v10  ;;  %v72_v27 = vand.u32 2147483647, %v55_v26 }
  0x10   :  { %186 = vadd.xlane.f32.xlu1 %v185_v6  ;;  %v181_v24 = vsel %vm180_vm1, %v179_v23, 0.0  ;;  %v66_v36 = vunpack.c.l.s4 %v394_v35  ;;  %v60_v47 = vmax.f32 %v55_v26, 0.0  ;;  %vm157_vm14 = vcmask 1024  }
  0x11   :  { %v73_v28 = vsub.f32 0.0, %v72_v27 }
  0x12   :  { %v67_v39 = vunpack.c.0.s8 %v66_v36 }
  0x13   :  { %v74_v30 = vmul.f32 1.442695, %v73_v28 }
  0x18   :  { %202 = vadd.xlane.f32.xlu1 %v201_v8 }
  0x21   :  { %126 = vperm.xlu0 %302, %v56_v9  }
  0x31   :  { %63 = vperm.xlu1 %303, %v282_v11  }
  0x80   :  { %v443_v12 = vpop.xlane.xlu0 %133 }
  0x81   :  { %v135_v13 = vsub.f32 %v122_v1, %v443_v12 }
  0x83   :  { %v136_v14 = vmul.f32 1.442695, %v135_v13  ;;  %v187_v25 = vpop.xlane.xlu1 %186 }
  0x84   :  { %vm195_vm6 = vcmp.eq.f32.partialorder %v187_v25, inf  ;;  %v198_v4 = vand.u32 2147483648, %v187_v25  ;;  %vm197_vm8 = vcmp.eq.f32.partialorder %v187_v25, 0.0 }
  0x85   :  { %304 = vpow2.f32 %v136_v14 }
  0x86   :  { %306 = vrsqrt.f32 %v187_v25 }
  0x87   :  { %308 = vpow2.f32 %v74_v30 }
  0x8b   :  { %v305_v15 = vpop.eup %304  ;;  %v203_v29 = vpop.xlane.xlu1 %202 }
  0x8c   :  { %v138_v16 = vsel %vm131_vm0, %v305_v15, 0.0  ;;  %310 = vrsqrt.f32 %v203_v29  ;;  %v307_v31 = vpop.eup %306  ;;  %vm211_vm7 = vcmp.eq.f32.partialorder %v203_v29, inf  ;;  %v214_v5 = vand.u32 2147483648, %v203_v29 }
  0x8d   :  { %139 = vadd.xlane.f32.xlu2 %v138_v16  ;;  %v309_v32 = vpop.eup %308  ;;  %v189_v37 = vmul.f32 %v307_v31, %v187_v25  ;;  %vm213_vm9 = vcmp.eq.f32.partialorder %v203_v29, 0.0 }
  0x8e   :  { %v76_v34 = vadd.f32 1.0, %v309_v32  ;;  %v79_v41 = vmul.f32 -0.5, %v309_v32  ;;  %v82_v49 = vand.u32 2147483647, %v309_v32 }
  0x8f   :  { %v190_v43 = vmul.f32 %v307_v31, %v189_v37 }
  0x90   :  { %312 = vlog2.f32 %v76_v34  ;;  %v80_v45 = vadd.f32 1.0, %v79_v41  ;;  %vm83_vm4 = vcmp.lt.f32.partialorder %v82_v49, 0.0004427343  ;;  %v395_v41 = vmov 512.0  }
  0x91   :  { %v191_v53 = vmul.f32 0.5, %v190_v43 }
  0x92   :  { %v311_v33 = vpop.eup %310  ;;  %v81_v51 = vmul.f32 %v309_v32, %v80_v45 }
  0x93   :  { %v127_v19 = vpop.permute.xlu0 %126  ;;  %v205_v38 = vmul.f32 %v311_v33, %v203_v29  ;;  %v192_v57 = vsub.f32 1.5, %v191_v53 }
  0x94   :  { %vm128_vm3 = vcmp.eq.s32.totalorder %v124_v18, %v127_v19 }
  0x95   :  { %v283_v20 = vsel %vm128_vm3, 1.0, %v393_v10  ;;  %v206_v44 = vmul.f32 %v311_v33, %v205_v38  ;;  %v193_v59 = vmul.f32 %v307_v31, %v192_v57 }
  0x96   :  { %v144_v21 = vmul.f32 %v283_v20, %v122_v1  ;;  %v313_v46 = vpop.eup %312 }
  0x97   :  { %v78_v50 = vmul.f32 0.6931472, %v313_v46  ;;  %v207_v54 = vmul.f32 0.5, %v206_v44  ;;  %v194_v63 = vmul.f32 %v193_v59, %v187_v25 }
  0x98   :  { %v145_v22 = vsel %vm131_vm0, %v144_v21, 0.0 }
  0x99   :  { %146 = vadd.xlane.f32.xlu2 %v145_v22  ;;  %v84_v55 = vsel %vm83_vm4, %v81_v51, %v78_v50  ;;  %v208_v58 = vsub.f32 1.5, %v207_v54  ;;  %v196_v6 = vsel %vm195_vm6, %v187_v25, %v194_v63 }
  0x9a   :  { %v199_v8 = vsel %vm197_vm8, %v198_v4, %v196_v6 }
  0x9b   :  { %v209_v60 = vmul.f32 %v311_v33, %v208_v58 }
  0x9d   :  { %v210_v0 = vmul.f32 %v209_v60, %v203_v29 }
  0x9f   :  { %v212_v7 = vsel %vm211_vm7, %v203_v29, %v210_v0 }
  0xa0   :  { %v215_v9 = vsel %vm213_vm9, %v214_v5, %v212_v7 }
  0xa1   :  { %182 = vadd.xlane.f32.xlu2 %v181_v24  ;;  %v216_v10 = vmul.f32 %v215_v9, %v199_v8 }
  0xa3   :  { %v64_v40 = vpop.permute.xlu1 %63  ;;  %v217_v13 = vmax.f32 %v216_v10, 1e-08 }
  0xa4   :  { %v68_v42 = vperm.slane %v64_v40, %v67_v39 }
  0xa5   :  { %vm223_vm10 = vweird.f32 %v217_v13  ;;  %v229_v27 = vand.u32 2147483648, %v217_v13  ;;  %v227_v29 = vand.u32 2147483647, %v217_v13 }
  0xa6   :  { %v70_v48 = vmul.f32 %v68_v42, %v55_v26 }
  0xa7   :  { %vm228_vm13 = vcmp.eq.f32.partialorder %v227_v29, 8.507059e+37 }
  0xa8   :  { %v71_v52 = vsub.f32 %v60_v47, %v70_v48 }
  0xaa   :  { %v85_v56 = vadd.f32 %v84_v55, %v71_v52  ;;  %v396_v55 = vmov 2.0  }
  0xac   :  { %88 = vst [vmem:[#allocation1] ss:$4 sm:$0xff] %v85_v56 }
  0xb3   :  { %v89_v61 = vld.sshfl [vmem:[#allocation1] sm:$0xff pattern:$0x73625140]  ;;  %v90_v62 = vld.sshfl [vmem:[#allocation1 + $0x8] sm:$0xff pattern:$0x73625140] }
  0xb4   :  { %v94_v1 = vsel %vm93_vm5, %v89_v61, 0.0  ;;  %v95_v2 = vsel %vm93_vm5, %v90_v62, 0.0 }
  0xb5   :  { %v96_v3 = vadd.f32 %v95_v2, %v94_v1 }
  0xb7   :  { %97 = vadd.xlane.f32.xlu2 %v96_v3 }
 0x100   :  { %v140_v11 = vpop.xlane.xlu2 %139 }
 0x101   :  { %314 = vlog2.f32 %v140_v11 }
 0x102   :  { %316 = vrcp.f32 %v217_v13 }
 0x107   :  { %v315_v14 = vpop.eup %314 }
 0x108   :  { %v142_v15 = vmul.f32 0.6931472, %v315_v14  ;;  %v317_v18 = vpop.eup %316 }
 0x109   :  { %v219_v21 = vmul.f32 %v317_v18, %v217_v13  ;;  %vm224_vm11 = vweird.f32 %v317_v18 }
 0x10a   :  { %v143_v16 = vadd.f32 %v142_v15, %v443_v12  ;;  %vm225_vm12 = vmor %vm223_vm10, %vm224_vm11  ;;  %v230_v12 = vor.u32 1.1754944e-38, %v229_v27 }
 0x10b   :  { %v220_v23 = vsub.f32 1.0, %v219_v21 }
 0x10c   :  { %v147_v17 = vpop.xlane.xlu2 %146 }
 0x10d   :  { %v148_v19 = vsub.f32 %v143_v16, %v147_v17  ;;  %v221_v24 = vmul.f32 %v317_v18, %v220_v23 }
 0x10f   :  { %v149_v20 = vsub.f32 0.0, %v148_v19  ;;  %v222_v28 = vadd.f32 %v317_v18, %v221_v24 }
 0x111   :  { %v150_v22 = vmul.f32 1.442695, %v149_v20  ;;  %v226_v32 = vsel %vm225_vm12, %v317_v18, %v222_v28 }
 0x112   :  { %v231_v36 = vsel %vm228_vm13, %v230_v12, %v226_v32 }
 0x113   :  { %318 = vpow2.f32 %v150_v22 }
 0x114   :  { %v183_v34 = vpop.xlane.xlu2 %182  ;;  %320 = vrcp.f32 %v395_v41 }
 0x115   :  { %v232_v37 = vmul.f32 %v231_v36, %v183_v34  ;;  %322 = vrcp.f32 %v396_v55 }
 0x117   :  { %v233_v39 = vsub.f32 1.0, %v232_v37 }
 0x119   :  { %v319_v25 = vpop.eup %318  ;;  %v234_v40 = vsel %vm157_vm14, %v233_v39, 0.0 }
 0x11a   :  { %v152_v26 = vsub.f32 1.0, %v319_v25  ;;  %v321_v42 = vpop.eup %320 }
 0x11b   :  { %v114_v43 = vmul.f32 512.0, %v321_v42  ;;  %vm118_vm15 = vweird.f32 %v321_v42  ;;  %v323_v56 = vpop.eup %322 }
 0x11c   :  { %v153_v30 = vmax.f32 %v152_v26, 0.0  ;;  %v169_v57 = vmul.f32 2.0, %v323_v56  ;;  %vm173_vm0 = vweird.f32 %v323_v56 }
 0x11d   :  { %v115_v44 = vsub.f32 1.0, %v114_v43 }
 0x11e   :  { %v154_v31 = vmul.f32 %v153_v30, %v153_v30  ;;  %v170_v58 = vsub.f32 1.0, %v169_v57 }
 0x11f   :  { %v116_v48 = vmul.f32 %v321_v42, %v115_v44 }
 0x120   :  { %v155_v33 = vmul.f32 0.25, %v154_v31  ;;  %v171_v62 = vmul.f32 %v323_v56, %v170_v58 }
 0x121   :  { %v117_v51 = vadd.f32 %v321_v42, %v116_v48 }
 0x122   :  { %v156_v35 = vmul.f32 %v155_v33, %v148_v19  ;;  %v172_v1 = vadd.f32 %v323_v56, %v171_v62 }
 0x123   :  { %v119_v54 = vsel %vm118_vm15, %v321_v42, %v117_v51 }
 0x124   :  { %v158_v38 = vsel %vm157_vm14, %v156_v35, 0.0  ;;  %v174_v7 = vsel %vm173_vm0, %v323_v56, %v172_v1 }
 0x125   :  { %159 = vadd.xlane.f32.xlu2 %v158_v38 }
 0x12a   :  { %v98_v45 = vpop.xlane.xlu2 %97 }
 0x12b   :  { %v99_v46 = vrot.slane %v98_v45, 4 }
 0x12d   :  { %235 = vadd.xlane.f32.xlu2 %v234_v40  ;;  %v100_v47 = vadd.f32 %v99_v46, %v98_v45 }
 0x12f   :  { %v101_v49 = vrot.slane %v100_v47, 2 }
 0x131   :  { %v102_v50 = vadd.f32 %v101_v49, %v100_v47 }
 0x133   :  { %v103_v52 = vrot.slane %v102_v50, 1 }
 0x135   :  { %v104_v53 = vadd.f32 %v103_v52, %v102_v50 }
 0x137   :  { %284 = vpush %v104_v53 }
 0x138   :  { %286 = vpush %v119_v54 }
 0x168   :  { %s285_s2 = spop %284 }
 0x169   :  { %s287_s30 = spop %286 }
 0x16a   :  { %s121_s6 = smul.f32 %s287_s30, %s285_s2 }
 0x16c   :  { %262 = sst [smem:[#allocation8 + $0x2]] %s121_s6  ;;  %s253_s10 = smul.f32 0.5, %s121_s6 }
 0x198   :  { %v160_v59 = vpop.xlane.xlu2 %159 }
 0x199   :  { %v161_v60 = vrot.slane %v160_v59, 4 }
 0x19b   :  { %v162_v61 = vadd.f32 %v161_v60, %v160_v59 }
 0x19d   :  { %v163_v63 = vrot.slane %v162_v61, 2 }
 0x19f   :  { %v164_v0 = vadd.f32 %v163_v63, %v162_v61 }
 0x1a0   :  { %v236_v2 = vpop.xlane.xlu2 %235 }
 0x1a1   :  { %v237_v3 = vrot.slane %v236_v2, 4  ;;  %v165_v4 = vrot.slane %v164_v0, 1 }
 0x1a3   :  { %v238_v5 = vadd.f32 %v237_v3, %v236_v2  ;;  %v166_v6 = vadd.f32 %v165_v4, %v164_v0 }
 0x1a5   :  { %v239_v8 = vrot.slane %v238_v5, 2  ;;  %288 = vpush %v166_v6 }
 0x1a6   :  { %290 = vpush %v174_v7 }
 0x1a7   :  { %v240_v9 = vadd.f32 %v239_v8, %v238_v5 }
 0x1a9   :  { %v241_v10 = vrot.slane %v240_v9, 1 }
 0x1ab   :  { %v242_v11 = vadd.f32 %v241_v10, %v240_v9 }
 0x1ad   :  { %292 = vpush %v242_v11 }
 0x1d6   :  { %s289_s7 = spop %288 }
 0x1d7   :  { %s291_s8 = spop %290 }
 0x1d8   :  { %s176_s9 = smul.f32 %s291_s8, %s289_s7 }
 0x1da   :  { %260 = sst [smem:[#allocation8 + $0x1]] %s176_s9 }
 0x1db   :  { %s254_s13 = sadd.f32 %s253_s10, %s176_s9 }
 0x1de   :  { %s293_s11 = spop %292 }
 0x1df   :  { %s252_s12 = smul.f32 %s293_s11, %s291_s8 }
 0x1e1   :  { %s255_s17 = smul.f32 0.1, %s252_s12  ;;  %264 = sst [smem:[#allocation8 + $0x3]] %s252_s12 }
 0x1e3   :  { %s256_s18 = sadd.f32 %s255_s17, %s254_s13 }
 0x1e5   :  { %258 = sst [smem:[#allocation8]] %s256_s18 }
 0x1e6   :  { %273 = dma.smem_to_hbm %s397_s19, 16, %s271_s16, [#allocation5]  }
 0x1e7   :  { %388 = dma.done.wait [#allocation5], 16  }
 0x1e8   :  { %389 = vsyncadd [#allocation5], 4294967280 }
 0x1e9   :  { %278 = sfence }
 0x1ea   :  { %279 = vsyncpa [#allocation4], 1 }
 0x1eb   :  { %280 = vsyncpa [#allocation7], 1 }
 0x1ec   :  { %281 = vsyncpa [#allocation5], 1 }

</bundles_post_ra>
